<compile_context>
chip_gen: v6e
topology: v6e:2x2x1
jax: 0.10.0
libtpu: 0.0.40
codegen_flags: <defaults>
</compile_context>

<pallas_src>
import jax
import jax.numpy as jnp
from jax.experimental import pallas as pl
from jax.experimental.pallas import tpu as pltpu

# Problem sizes (small, consistent with the module definition).
N, CIN, H, W = 2, 2, 3, 3
COUT, KH, KW = 2, 2, 2
HO, WO = H - KH + 1, W - KW + 1          # 2, 2
LIN_IN, LIN_OUT = WO, 3                   # Linear(2, 3) acts on the last (width) dim
BN_EPS = 1e-5
K_CONV = CIN * KH * KW                    # 8  (im2col contraction length)
NHO = N * HO                              # 4
COUNT = LIN_OUT * N * HO                  # 12 elements per channel for BN stats


def model_kernel(pt_ref, wc_ref, cb_ref, wl_ref, lb_ref, gamma_ref, beta_ref,
                 out_ref, stats_ref):
    # pt_ref   : (K_CONV, WO*N*HO)  f32 VMEM  im2col patches, cols ordered (j, n, i)
    # wc_ref   : (COUT, K_CONV)     f32 VMEM  conv weight reshaped
    # cb_ref   : (COUT, 1)          f32 VMEM  conv bias column
    # wl_ref   : (LIN_OUT*LIN_IN,)  f32 SMEM  linear weight, flat row-major (o, j)
    # lb_ref   : (LIN_OUT,)         f32 SMEM  linear bias
    # gamma_ref/beta_ref : (COUT,1) f32 VMEM  BN affine columns
    # out_ref  : (1, 1)             f32 VMEM  global sum
    # stats_ref: (COUT, 2)          f32 VMEM  per-channel [mean, var] (validation aid)

    # ---- Conv2d(2,2,k=2) as ONE matmul over im2col patches --------------------
    # (COUT, K) @ (K, WO*N*HO) -> (COUT, WO*N*HO); columns ordered (j, n, i).
    conv = jnp.dot(wc_ref[...], pt_ref[...], preferred_element_type=jnp.float32)
    conv = conv + cb_ref[...]                      # broadcast (COUT, 1) over lanes

    # ---- Linear(2 -> 3) over the conv width dim j, on the VPU (K == 2) --------
    c0 = conv[:, 0 * NHO:1 * NHO]                  # j = 0 slab, (COUT, N*HO)
    c1 = conv[:, 1 * NHO:2 * NHO]                  # j = 1 slab, (COUT, N*HO)
    lin = [c0 * wl_ref[o * LIN_IN + 0] + c1 * wl_ref[o * LIN_IN + 1] + lb_ref[o]
           for o in range(LIN_OUT)]
    # Stack all outputs along lanes -> (COUT, LIN_OUT*N*HO) = (2, 12), then ReLU once.
    y = jnp.maximum(jnp.concatenate(lin, axis=-1), 0.0)

    # ---- BatchNorm over the channel dim (rows), biased batch stats, two-pass --
    inv_count = 1.0 / float(COUNT)
    mean = jnp.sum(y, axis=-1, keepdims=True) * inv_count        # (COUT, 1)
    d = y - mean
    var = jnp.sum(d * d, axis=-1, keepdims=True) * inv_count     # (COUT, 1), biased
    inv = jax.lax.rsqrt(var + BN_EPS)
    z = d * (inv * gamma_ref[...]) + beta_ref[...]               # (COUT, 12)

    # ---- Global sum (analytically == COUNT * sum(beta); full compute kept) ----
    out_ref[...] = jnp.sum(z, keepdims=True)
    stats_ref[...] = jnp.concatenate([mean, var], axis=-1)       # (COUT, 2)


def model_forward(x, conv_w, conv_b, lin_w, lin_b, gamma, beta):
    x = x.astype(jnp.float32)

    # im2col: pure gather/transpose (layout only, no arithmetic).
    # PT[(ci, ki, kj), (j, n, i)] = x[n, ci, i+ki, j+kj]
    windows = jnp.stack(
        [x[:, :, ki:ki + HO, kj:kj + WO] for ki in range(KH) for kj in range(KW)],
        axis=0)                                        # (KH*KW, N, CIN, HO, WO)
    pt = jnp.transpose(windows, (2, 0, 4, 1, 3)).reshape(K_CONV, WO * N * HO)

    wc = conv_w.reshape(COUT, K_CONV).astype(jnp.float32)   # (2, 8)
    cb = conv_b.reshape(COUT, 1).astype(jnp.float32)
    wl = lin_w.reshape(-1).astype(jnp.float32)               # flat, index o*LIN_IN + j
    lb = lin_b.astype(jnp.float32)
    g = gamma.reshape(COUT, 1).astype(jnp.float32)
    b = beta.reshape(COUT, 1).astype(jnp.float32)

    total, stats = pl.pallas_call(
        model_kernel,
        out_shape=(jax.ShapeDtypeStruct((1, 1), jnp.float32),
                   jax.ShapeDtypeStruct((COUT, 2), jnp.float32)),
        in_specs=[
            pl.BlockSpec(memory_space=pltpu.MemorySpace.VMEM),   # im2col patches
            pl.BlockSpec(memory_space=pltpu.MemorySpace.VMEM),   # conv weight (COUT, K)
            pl.BlockSpec(memory_space=pltpu.MemorySpace.VMEM),   # conv bias column
            pl.BlockSpec(memory_space=pltpu.MemorySpace.SMEM),   # linear weight (flat)
            pl.BlockSpec(memory_space=pltpu.MemorySpace.SMEM),   # linear bias
            pl.BlockSpec(memory_space=pltpu.MemorySpace.VMEM),   # bn gamma column
            pl.BlockSpec(memory_space=pltpu.MemorySpace.VMEM),   # bn beta column
        ],
        out_specs=(pl.BlockSpec(memory_space=pltpu.MemorySpace.VMEM),
                   pl.BlockSpec(memory_space=pltpu.MemorySpace.VMEM)),
    )(pt, wc, cb, wl, lb, g, b)

    return total[0, 0], stats[:, 0], stats[:, 1]


def reference_forward(x, conv_w, conv_b, lin_w, lin_b, gamma, beta):
    # Pure-JAX reference with identical semantics.
    y = jax.lax.conv_general_dilated(
        x, conv_w, window_strides=(1, 1), padding="VALID",
        dimension_numbers=("NCHW", "OIHW", "NCHW"))
    y = y + conv_b.reshape(1, COUT, 1, 1)
    y = jnp.einsum("nchw,ow->ncho", y, lin_w) + lin_b   # Linear on the last dim
    y = jnp.maximum(y, 0.0)
    mean = jnp.mean(y, axis=(0, 2, 3))
    var = jnp.var(y, axis=(0, 2, 3))                    # biased
    z = (y - mean.reshape(1, COUT, 1, 1)) * jax.lax.rsqrt(var.reshape(1, COUT, 1, 1) + BN_EPS)
    z = z * gamma.reshape(1, COUT, 1, 1) + beta.reshape(1, COUT, 1, 1)
    return jnp.sum(z), mean, var


if __name__ == "__main__":
    key = jax.random.PRNGKey(0)
    k_x, k_cw, k_cb, k_lw, k_lb = jax.random.split(key, 5)

    x = jax.random.normal(k_x, (N, CIN, H, W), dtype=jnp.float32)
    conv_w = jax.random.normal(k_cw, (COUT, CIN, KH, KW), dtype=jnp.float32) * 0.3
    conv_b = jax.random.normal(k_cb, (COUT,), dtype=jnp.float32) * 0.1
    lin_w = jax.random.normal(k_lw, (LIN_OUT, LIN_IN), dtype=jnp.float32) * 0.5
    lin_b = jax.random.normal(k_lb, (LIN_OUT,), dtype=jnp.float32) * 0.1
    gamma = jnp.ones((COUT,), dtype=jnp.float32)   # PyTorch BatchNorm default weight
    beta = jnp.zeros((COUT,), dtype=jnp.float32)   # PyTorch BatchNorm default bias

    fwd = jax.jit(model_forward)
    total, mean, var = fwd(x, conv_w, conv_b, lin_w, lin_b, gamma, beta)
    total = jax.block_until_ready(total)

    ref_total, ref_mean, ref_var = reference_forward(x, conv_w, conv_b, lin_w, lin_b,
                                                     gamma, beta)
    ref_total = jax.block_until_ready(ref_total)

    assert jnp.isfinite(total), "kernel produced non-finite output"
    assert abs(float(total) - float(ref_total)) < 1e-3, (float(total), float(ref_total))
    # The scalar alone is analytically COUNT*sum(beta); validate the conv+linear+BN-stats
    # path through the auxiliary per-channel statistics.
    assert jnp.allclose(mean, ref_mean, rtol=5e-3, atol=5e-3), (mean, ref_mean)
    assert jnp.allclose(var, ref_var, rtol=5e-3, atol=5e-3), (var, ref_var)
    print("KERNEL_OK")
</pallas_src>

<mosaic_0001>
module attributes {stable_mosaic.version = 11 : i64} {
  func.func @model_kernel(%arg0: memref<8x8xf32, #tpu.memory_space<vmem>>, %arg1: memref<2x8xf32, #tpu.memory_space<vmem>>, %arg2: memref<2x1xf32, #tpu.memory_space<vmem>>, %arg3: memref<6xf32, #tpu.memory_space<smem>>, %arg4: memref<3xf32, #tpu.memory_space<smem>>, %arg5: memref<2x1xf32, #tpu.memory_space<vmem>>, %arg6: memref<2x1xf32, #tpu.memory_space<vmem>>, %arg7: memref<1x1xf32, #tpu.memory_space<vmem>>, %arg8: memref<2x2xf32, #tpu.memory_space<vmem>>) attributes {dimension_semantics = [], scalar_prefetch = 0 : i64, scratch_operands = 0 : i64, tpu.core_type = #tpu.core_type<tc>} {
    %c0 = arith.constant 0 : index
    %c0_0 = arith.constant 0 : index
    %0 = vector.load %arg1[%c0, %c0_0] : memref<2x8xf32, #tpu.memory_space<vmem>>, vector<2x8xf32>
    %c0_1 = arith.constant 0 : index
    %c0_2 = arith.constant 0 : index
    %1 = vector.load %arg0[%c0_1, %c0_2] : memref<8x8xf32, #tpu.memory_space<vmem>>, vector<8x8xf32>
    %cst = arith.constant dense<0.000000e+00> : vector<2x8xf32>
    %2 = tpu.matmul %0, %1, %cst {dimension_numbers = #tpu.dot_dimension_numbers<[1], [0], [0], [1], [0, 0, 1, 1], [], []>} : vector<2x8xf32>, vector<8x8xf32>, vector<2x8xf32> -> vector<2x8xf32>
    %c0_3 = arith.constant 0 : index
    %c0_4 = arith.constant 0 : index
    %3 = vector.load %arg2[%c0_3, %c0_4] : memref<2x1xf32, #tpu.memory_space<vmem>>, vector<2x1xf32>
    %4 = vector.broadcast %3 : vector<2x1xf32> to vector<2x8xf32>
    %5 = arith.addf %2, %4 : vector<2x8xf32>
    %6 = vector.extract_strided_slice %5 {offsets = [0, 0], sizes = [2, 4], strides = [1, 1]} : vector<2x8xf32> to vector<2x4xf32>
    %7 = vector.extract_strided_slice %5 {offsets = [0, 4], sizes = [2, 4], strides = [1, 1]} : vector<2x8xf32> to vector<2x4xf32>
    %c0_5 = arith.constant 0 : index
    %8 = memref.load %arg3[%c0_5] : memref<6xf32, #tpu.memory_space<smem>>
    %9 = vector.broadcast %8 : f32 to vector<2x4xf32>
    %10 = arith.mulf %6, %9 : vector<2x4xf32>
    %c1 = arith.constant 1 : index
    %11 = memref.load %arg3[%c1] : memref<6xf32, #tpu.memory_space<smem>>
    %12 = vector.broadcast %11 : f32 to vector<2x4xf32>
    %13 = arith.mulf %7, %12 : vector<2x4xf32>
    %14 = arith.addf %10, %13 : vector<2x4xf32>
    %c0_6 = arith.constant 0 : index
    %15 = memref.load %arg4[%c0_6] : memref<3xf32, #tpu.memory_space<smem>>
    %16 = vector.broadcast %15 : f32 to vector<2x4xf32>
    %17 = arith.addf %14, %16 : vector<2x4xf32>
    %c2 = arith.constant 2 : index
    %18 = memref.load %arg3[%c2] : memref<6xf32, #tpu.memory_space<smem>>
    %19 = vector.broadcast %18 : f32 to vector<2x4xf32>
    %20 = arith.mulf %6, %19 : vector<2x4xf32>
    %c3 = arith.constant 3 : index
    %21 = memref.load %arg3[%c3] : memref<6xf32, #tpu.memory_space<smem>>
    %22 = vector.broadcast %21 : f32 to vector<2x4xf32>
    %23 = arith.mulf %7, %22 : vector<2x4xf32>
    %24 = arith.addf %20, %23 : vector<2x4xf32>
    %c1_7 = arith.constant 1 : index
    %25 = memref.load %arg4[%c1_7] : memref<3xf32, #tpu.memory_space<smem>>
    %26 = vector.broadcast %25 : f32 to vector<2x4xf32>
    %27 = arith.addf %24, %26 : vector<2x4xf32>
    %c4 = arith.constant 4 : index
    %28 = memref.load %arg3[%c4] : memref<6xf32, #tpu.memory_space<smem>>
    %29 = vector.broadcast %28 : f32 to vector<2x4xf32>
    %30 = arith.mulf %6, %29 : vector<2x4xf32>
    %c5 = arith.constant 5 : index
    %31 = memref.load %arg3[%c5] : memref<6xf32, #tpu.memory_space<smem>>
    %32 = vector.broadcast %31 : f32 to vector<2x4xf32>
    %33 = arith.mulf %7, %32 : vector<2x4xf32>
    %34 = arith.addf %30, %33 : vector<2x4xf32>
    %c2_8 = arith.constant 2 : index
    %35 = memref.load %arg4[%c2_8] : memref<3xf32, #tpu.memory_space<smem>>
    %36 = vector.broadcast %35 : f32 to vector<2x4xf32>
    %37 = arith.addf %34, %36 : vector<2x4xf32>
    %38 = tpu.concatenate %17, %27, %37 in 1 : vector<2x4xf32>, vector<2x4xf32>, vector<2x4xf32> -> vector<2x12xf32>
    %cst_9 = arith.constant 0.000000e+00 : f32
    %39 = vector.broadcast %cst_9 : f32 to vector<2x12xf32>
    %40 = arith.maximumf %38, %39 : vector<2x12xf32>
    %cst_10 = arith.constant dense<0.000000e+00> : vector<2xf32>
    %41 = vector.multi_reduction <add>, %40, %cst_10 [1] : vector<2x12xf32> to vector<2xf32>
    %42 = vector.shape_cast %41 : vector<2xf32> to vector<2x1xf32>
    %cst_11 = arith.constant 0.0833333358 : f32
    %43 = vector.broadcast %cst_11 : f32 to vector<2x1xf32>
    %44 = arith.mulf %42, %43 : vector<2x1xf32>
    %45 = vector.broadcast %44 : vector<2x1xf32> to vector<2x12xf32>
    %46 = arith.subf %40, %45 : vector<2x12xf32>
    %47 = arith.mulf %46, %46 : vector<2x12xf32>
    %cst_12 = arith.constant dense<0.000000e+00> : vector<2xf32>
    %48 = vector.multi_reduction <add>, %47, %cst_12 [1] : vector<2x12xf32> to vector<2xf32>
    %49 = vector.shape_cast %48 : vector<2xf32> to vector<2x1xf32>
    %cst_13 = arith.constant 0.0833333358 : f32
    %50 = vector.broadcast %cst_13 : f32 to vector<2x1xf32>
    %51 = arith.mulf %49, %50 : vector<2x1xf32>
    %cst_14 = arith.constant 9.99999974E-6 : f32
    %52 = vector.broadcast %cst_14 : f32 to vector<2x1xf32>
    %53 = arith.addf %51, %52 : vector<2x1xf32>
    %54 = math.rsqrt %53 : vector<2x1xf32>
    %c0_15 = arith.constant 0 : index
    %c0_16 = arith.constant 0 : index
    %55 = vector.load %arg5[%c0_15, %c0_16] : memref<2x1xf32, #tpu.memory_space<vmem>>, vector<2x1xf32>
    %56 = arith.mulf %54, %55 : vector<2x1xf32>
    %57 = vector.broadcast %56 : vector<2x1xf32> to vector<2x12xf32>
    %58 = arith.mulf %46, %57 : vector<2x12xf32>
    %c0_17 = arith.constant 0 : index
    %c0_18 = arith.constant 0 : index
    %59 = vector.load %arg6[%c0_17, %c0_18] : memref<2x1xf32, #tpu.memory_space<vmem>>, vector<2x1xf32>
    %60 = vector.broadcast %59 : vector<2x1xf32> to vector<2x12xf32>
    %61 = arith.addf %58, %60 : vector<2x12xf32>
    %62 = vector.shape_cast %61 : vector<2x12xf32> to vector<1x2x12xf32>
    %cst_19 = arith.constant dense<0.000000e+00> : vector<1xf32>
    %63 = vector.multi_reduction <add>, %62, %cst_19 [1, 2] : vector<1x2x12xf32> to vector<1xf32>
    %64 = vector.shape_cast %63 : vector<1xf32> to vector<1x1x1xf32>
    %65 = vector.extract %64[0, 0, 0] : f32 from vector<1x1x1xf32>
    %66 = vector.broadcast %65 : f32 to vector<1x1xf32>
    %c0_20 = arith.constant 0 : index
    %c0_21 = arith.constant 0 : index
    %67 = vector.load %arg7[%c0_20, %c0_21] : memref<1x1xf32, #tpu.memory_space<vmem>>, vector<1x1xf32>
    tpu.vector_store %arg7[%c0_20, %c0_21], %66 {strides = array<i32>} : memref<1x1xf32, #tpu.memory_space<vmem>>, vector<1x1xf32>,
    %68 = tpu.concatenate %44, %51 in 1 : vector<2x1xf32>, vector<2x1xf32> -> vector<2x2xf32>
    %c0_22 = arith.constant 0 : index
    %c0_23 = arith.constant 0 : index
    %69 = vector.load %arg8[%c0_22, %c0_23] : memref<2x2xf32, #tpu.memory_space<vmem>>, vector<2x2xf32>
    tpu.vector_store %arg8[%c0_22, %c0_23], %68 {strides = array<i32>} : memref<2x2xf32, #tpu.memory_space<vmem>>, vector<2x2xf32>,
    return
  }
}

</mosaic_0001>

<bundles_post_ra>
// kernel: model_forward.1
= control target key start
LH: loop header
LB: loop body
LE: loop exit
PB: predicated region body
PF: predicated region fallthrough
CT: control target
= control target key end

     0   :  { %14 = vsyncpa [#allocation4], 0  ;;  %s421_s0 = inlined_call_operand.vmem [shape: f32[8,8], index: 0, kind: input, shape index: {}]   ;;  %s422_s1 = inlined_call_operand.vmem [shape: f32[2,8], index: 1, kind: input, shape index: {}]   ;;  %s423_s2 = inlined_call_operand.vmem [shape: f32[2,1], index: 2, kind: input, shape index: {}]   ;;  %s424_s3 = inlined_call_operand.vmem [shape: f32[6], index: 3, kind: input, shape index: {}]   ;;  %s425_s4 = inlined_call_operand.vmem [shape: f32[3], index: 4, kind: input, shape index: {}]   ;;  %s426_s5 = inlined_call_operand.vmem [shape: f32[2,1], index: 5, kind: input, shape index: {}]   ;;  %s427_s6 = inlined_call_operand.vmem [shape: f32[2,1], index: 6, kind: input, shape index: {}]   ;;  %s428_s7 = inlined_call_operand.hbm [shape: f32[1,1], index: 7, kind: output, shape index: {0}]   ;;  %s429_s8 = inlined_call_operand.vmem [shape: f32[2,2], index: 8, kind: output, shape index: {1}]  }
   0x1   :  { %15 = vsyncpa [#allocation6], 0 }
   0x2   :  { %16 = vsyncpa [#allocation3], 0  ;;  %s29_s29 = sshll.u32 %s424_s3, 4  ;;  %s39_s10 = sshll.u32 %s425_s4, 4  ;;  %s30_s29 = int_to_ptr.vmem [resolvable:$true] %s29_s29  ;;  %s40_s10 = int_to_ptr.vmem [resolvable:$true] %s39_s10 }
   0x3   :  { %s285_s11 = scalar_lea.vmem %s30_s29, 16  ;;  %p290_p1 = scmp.lt.s32.totalorder %s30_s29, %s30_s29 }
   0x4   :  { %p286_p0 = scmp.ne.s32.totalorder %s30_s29, %s285_s11  ;;  %p291_p2 = scmp.lt.s32.totalorder %s285_s11, %s285_s11 }
   0x6   :  { %p292_p3 = por %p291_p2, %p290_p1 }
   0x8   :  { %p293_p4 = pnand %p292_p3, %p286_p0 }
   0xa   :  { %296 = shalt.err (!%p293_p4)
}
   0xb   :  { %s335_s12 = smov [#allocation2]   ;;  %s297_s13 = scalar_lea.vmem %s40_s10, 16 }
   0xc   :  { %32 = dma.vmem_to_smem %s30_s29, 16, %s335_s12, [#allocation4]  }
   0xd   :  { %p298_p5 = scmp.ne.s32.totalorder %s40_s10, %s297_s13  ;;  %p302_p6 = scmp.lt.s32.totalorder %s40_s10, %s40_s10 }
   0xe   :  { %p303_p7 = scmp.lt.s32.totalorder %s297_s13, %s297_s13 }
  0x10   :  { %p304_p8 = por %p303_p7, %p302_p6 }
  0x12   :  { %p305_p9 = pnand %p304_p8, %p298_p5 }
  0x14   :  { %308 = shalt.err (!%p305_p9)
}
  0x15   :  { %s336_s3 = smov [#allocation5]  }
  0x16   :  { %42 = dma.vmem_to_smem %s40_s10, 16, %s336_s3, [#allocation6]  }
  0x17   :  { %329 = dma.done.wait [#allocation4], 16  }
  0x18   :  { %330 = vsyncadd [#allocation4], 4294967280 }
  0x19   :  { %331 = dma.done.wait [#allocation6], 16  }
  0x1a   :  { %332 = vsyncadd [#allocation6], 4294967280 }
  0x1b   :  { %53 = sfence }
  0x1c   :  { %v55_v0 = vld [vmem:[%s421_s0] sm:$0xff]  ;;  %vm62_vm0 = vcmask 64512   ;;  %v337_v2 = vmov 0.0   ;;  %vm338_vm1 = vmmov 0   ;;  %v339_v4 = vmov 0   ;;  %s261_s0 = sld [smem:[#allocation2 + $0x5]] }
  0x1d   :  { %v54_v1 = vld [vmem:[%s422_s1] sm:$0x3]  ;;  %265 = vmatprep.subr.mxu0 %v337_v2  ;;  %267 = vmatprep.mubr.msk.f32.mxu0 %vm338_vm1, %v337_v2  ;;  %s258_s19 = sld [smem:[#allocation2 + $0x3]]  ;;  %s340_s1 = smov 124   ;;  %vm186_vm2 = vcmask 31744   ;;  %vm190_vm3 = vcmask 91136  }
  0x1e   :  { %v56_v3 = vld [vmem:[%s423_s2] sm:$0x3]  ;;  %266 = vmatpush3.msra.mxu0 %v55_v0  ;;  %281 = vset.pattern.permute.xlu0 %v339_v4  ;;  %s256_s20 = sld [smem:[#allocation2 + $0x1]]  ;;  %s341_s24 = smov 4   ;;  %vm231_vm4 = vcmask 7168   ;;  %vm233_vm5 = vcmask 9216  }
  0x1f   :  { %268 = vmatmul.mubr.msk.f32.vlgmr.msra.gmra.mxu0 %vm62_vm0, %v54_v1  ;;  %59 = vperm.xlu0 %281, %v56_v3   ;;  %s260_s2 = sld [smem:[#allocation2 + $0x4]]  ;;  %s342_s25 = smov 8   ;;  %v211_v44 = vld [vmem:[%s427_s6] sm:$0x3]  ;;  %vm229_vm6 = vcmask 0  }
  0x20   :  { %282 = vset.pattern.permute.xlu1 %v339_v4  ;;  %s257_s21 = sld [smem:[#allocation2 + $0x2]]  ;;  %v203_v49 = vld [vmem:[%s426_s5] sm:$0x3]  ;;  %s343_s6 = smov [#allocation7]  }
  0x21   :  { %s262_s22 = sld [smem:[#allocation5 + $0x2]]  ;;  %s241_s5 = sshll.u32 %s343_s6, 4  ;;  %s242_s5 = int_to_ptr.vmem [resolvable:$true] %s241_s5 }
  0x22   :  { %v168_v7 = vstv %s261_s0  ;;  %s259_s23 = sld [smem:[#allocation5 + $0x1]]  ;;  %s309_s12 = scalar_lea.vmem %s242_s5, 16 }
  0x23   :  { %v154_v8 = vstv %s258_s19  ;;  %s136_s26 = sld [smem:[#allocation2]]  ;;  %p310_p10 = scmp.ne.s32.totalorder %s242_s5, %s309_s12 }
  0x24   :  { %v140_v13 = vstv %s256_s20  ;;  %s147_s27 = sld [smem:[#allocation5]]  ;;  %s313_s13 = scalar_lea.vmem %s242_s5, 32 }
  0x25   :  { %v165_v15 = vstv %s260_s2  ;;  %p314_p11 = scmp.lt.s32.totalorder %s242_s5, %s242_s5  ;;  %p315_p12 = scmp.lt.s32.totalorder %s313_s13, %s309_s12 }
  0x26   :  { %v151_v16 = vstv %s257_s21 }
  0x27   :  { %v176_v19 = vstv %s262_s22  ;;  %p316_p13 = por %p315_p12, %p314_p11 }
  0x28   :  { %v162_v21 = vstv %s259_s23 }
  0x29   :  { %v137_v27 = vstv %s136_s26  ;;  %p317_p0 = pnand %p316_p13, %p310_p10 }
  0x2a   :  { %v148_v31 = vstv %s147_s27 }
  0x9a   :  { %v60_v5 = vpop.permute.xlu0 %59 }
  0xdf   :  { %v132_v6 = vpop.f32.mrf.mxu0 }
  0xe0   :  { %v133_v9 = vadd.f32 %v132_v6, %v60_v5 }
  0xe1   :  { %v269_v10 = vpop.f32.mrf.mxu0 }
  0xe2   :  { %v169_v11 = vmul.f32 %v168_v7, %v133_v9  ;;  %v155_v12 = vmul.f32 %v154_v8, %v133_v9  ;;  %v141_v14 = vmul.f32 %v140_v13, %v133_v9  ;;  %v166_v17 = vmul.f32 %v165_v15, %v133_v9 }
  0xe3   :  { %v152_v18 = vmul.f32 %v151_v16, %v133_v9  ;;  %v138_v29 = vmul.f32 %v137_v27, %v133_v9 }
  0xe4   :  { %171 = vrot.lane.b32.xlu1 %v169_v11, %s340_s1  ;;  %157 = vrot.lane.b32.xlu0 %v155_v12, %s340_s1 }
  0xe8   :  { %143 = vrot.lane.b32.xlu1 %v141_v14, %s340_s1 }
 0x156   :  { %v172_v20 = vpop.permute.xlu1 %171  ;;  %v158_v22 = vpop.permute.xlu0 %157 }
 0x157   :  { %v174_v23 = vadd.f32 %v172_v20, %v166_v17  ;;  %v160_v24 = vadd.f32 %v158_v22, %v152_v18 }
 0x159   :  { %v177_v25 = vadd.f32 %v176_v19, %v174_v23  ;;  %v163_v26 = vadd.f32 %v162_v21, %v160_v24 }
 0x15a   :  { %v144_v28 = vpop.permute.xlu1 %143 }
 0x15b   :  { %179 = vrot.lane.b32.xlu0 %v163_v26, %s341_s24  ;;  %183 = vrot.lane.b32.xlu1 %v177_v25, %s342_s25  ;;  %v146_v30 = vadd.f32 %v144_v28, %v138_v29 }
 0x15d   :  { %v149_v32 = vadd.f32 %v148_v31, %v146_v30 }
 0x1cd   :  { %v180_v33 = vpop.permute.xlu0 %179  ;;  %v184_v34 = vpop.permute.xlu1 %183 }
 0x1ce   :  { %v187_v35 = vsel %vm186_vm2, %v149_v32, %v180_v33 }
 0x1cf   :  { %v188_v36 = vsel %vm62_vm0, %v187_v35, %v184_v34 }
 0x1d0   :  { %v189_v37 = vmax.f32 %v188_v36, 0.0 }
 0x1d2   :  { %v191_v38 = vsel %vm190_vm3, %v189_v37, 0.0 }
 0x1d3   :  { %192 = vadd.xlane.f32.xlu0 %v191_v38 }
 0x25c   :  { %v193_v39 = vpop.xlane.xlu0 %192 }
 0x25d   :  { %v194_v40 = vmul.f32 0.083333336, %v193_v39 }
 0x25f   :  { %v195_v41 = vsub.f32 %v189_v37, %v194_v40 }
 0x261   :  { %v196_v42 = vmul.f32 %v195_v41, %v195_v41 }
 0x263   :  { %v197_v43 = vsel %vm190_vm3, %v196_v42, 0.0 }
 0x264   :  { %198 = vadd.xlane.f32.xlu1 %v197_v43 }
 0x275   :  { %214 = vperm.xlu1 %282, %v211_v44  }
 0x2ed   :  { %v199_v45 = vpop.xlane.xlu1 %198 }
 0x2ee   :  { %v200_v46 = vmul.f32 0.083333336, %v199_v45 }
 0x2f0   :  { %v201_v47 = vadd.f32 1e-05, %v200_v46  ;;  %v232_v48 = vsel %vm231_vm4, %v194_v40, %v200_v46 }
 0x2f1   :  { %234 = vst.msk [vmem:[%s429_s8] sm:$0x3] %vm233_vm5, %v232_v48  ;;  %v215_v53 = vpop.permute.xlu1 %214 }
 0x2f2   :  { %283 = vrsqrt.f32 %v201_v47 }
 0x2ff   :  { %v284_v50 = vpop.eup %283 }
 0x300   :  { %v204_v51 = vmul.f32 %v284_v50, %v203_v49 }
 0x302   :  { %207 = vperm.xlu0 %281, %v204_v51  }
 0x37d   :  { %v208_v52 = vpop.permute.xlu0 %207 }
 0x37e   :  { %v210_v54 = vmul.f32 %v208_v52, %v195_v41 }
 0x380   :  { %v217_v55 = vadd.f32 %v215_v53, %v210_v54 }
 0x382   :  { %v218_v56 = vsel %vm190_vm3, %v217_v55, 0.0 }
 0x383   :  { %219 = vadd.xlane.f32.xlu0 %v218_v56 }
 0x40c   :  { %v220_v57 = vpop.xlane.xlu0 %219 }
 0x40d   :  { %v221_v58 = vrot.slane %v220_v57, 4 }
 0x40f   :  { %v222_v59 = vadd.f32 %v221_v58, %v220_v57 }
 0x411   :  { %v223_v60 = vrot.slane %v222_v59, 2 }
 0x413   :  { %v224_v61 = vadd.f32 %v223_v60, %v222_v59 }
 0x415   :  { %v225_v62 = vrot.slane %v224_v61, 1 }
 0x417   :  { %v226_v63 = vadd.f32 %v225_v62, %v224_v61 }
 0x419   :  { %270 = vpush %v226_v63 }
 0x44a   :  { %s271_s8 = spop %270 }
 0x44b   :  { %v228_v0 = vstv %s271_s8 }
 0x44c   :  { %230 = vst.msk [vmem:[#allocation7] sm:$0x1] %vm229_vm6, %v228_v0 }
 0x44d   :  { %320 = shalt.err (!%p317_p0)
}
 0x44e   :  { %244 = dma.vmem_to_hbm [thread:$0]  %s242_s5, 16, %s428_s7, [#allocation3]  }
 0x44f   :  { %333 = dma.done.wait [#allocation3], 16  }
 0x450   :  { %334 = vsyncadd [#allocation3], 4294967280 }
 0x451   :  { %252 = vsyncpa [#allocation3], 1 }
 0x452   :  { %253 = vsyncpa [#allocation4], 1 }
 0x453   :  { %254 = vsyncpa [#allocation6], 1 }

</bundles_post_ra>
